<compile_context>
chip_gen: v7x
topology: tpu7x:2x2x1
jax: 0.10.0
libtpu: 0.0.40
codegen_flags: <defaults>
</compile_context>

<pallas_src>
import jax
import jax.numpy as jnp
from jax.experimental import pallas as pl
from jax.experimental.pallas import tpu as pltpu


def linear_relu_kernel(x_ref, w_ref, b_ref, o_ref, acc_ref):
    # x_ref: (tm, tk) bf16, w_ref: (tk, tn) bf16, b_ref: (1, tn) f32
    k = pl.program_id(2)

    @pl.when(k == 0)
    def _():
        acc_ref[...] = jnp.zeros_like(acc_ref)

    # bf16 MXU matmul, f32 accumulate.
    acc_ref[...] += jnp.dot(x_ref[...], w_ref[...],
                            preferred_element_type=jnp.float32)

    # Bias + ReLU only once, in the finalize branch (f32 epilogue).
    @pl.when(k == pl.num_programs(2) - 1)
    def _():
        y = acc_ref[...] + b_ref[...]
        o_ref[...] = jnp.maximum(y, 0.0).astype(o_ref.dtype)


def linear_relu(x, w, b, *, tm=128, tn=128, tk=128):
    """y = relu(x @ w + b), tiled Pallas matmul.

    x: (M, K) any float dtype; w: (K, N); b: (1, N).  Returns (M, N) float32.
    Pads M/K/N up to tile multiples with zeros (zero pad rows/cols preserve
    the result exactly) and slices the padding off the output.
    """
    m, k = x.shape
    k2, n = w.shape
    assert k == k2 and b.shape == (1, n)

    mp = pl.cdiv(m, tm) * tm
    kp = pl.cdiv(k, tk) * tk
    np_ = pl.cdiv(n, tn) * tn

    # bf16 operands for the MXU; zero padding on M/K/N (weights padded with
    # zeros, not garbage, so results are unchanged).
    xp = jnp.pad(x.astype(jnp.bfloat16), ((0, mp - m), (0, kp - k)))
    wp = jnp.pad(w.astype(jnp.bfloat16), ((0, kp - k), (0, np_ - n)))
    bp = jnp.pad(b.astype(jnp.float32), ((0, 0), (0, np_ - n)))

    grid = (mp // tm, np_ // tn, kp // tk)

    out = pl.pallas_call(
        linear_relu_kernel,
        out_shape=jax.ShapeDtypeStruct((mp, np_), jnp.float32),
        grid_spec=pltpu.PrefetchScalarGridSpec(
            num_scalar_prefetch=0,
            grid=grid,
            in_specs=[
                pl.BlockSpec((tm, tk), lambda i, j, kk: (i, kk)),  # x tile
                pl.BlockSpec((tk, tn), lambda i, j, kk: (kk, j)),  # w tile
                pl.BlockSpec((1, tn), lambda i, j, kk: (0, j)),    # bias tile
            ],
            out_specs=pl.BlockSpec((tm, tn), lambda i, j, kk: (i, j)),
            scratch_shapes=[pltpu.VMEM((tm, tn), jnp.float32)],
        ),
        compiler_params=pltpu.CompilerParams(
            # M / N_out tiles are independent (megacore-shardable on v7x);
            # K is the reduction axis -> arbitrary, placed last.
            dimension_semantics=("parallel", "parallel", "arbitrary"),
        ),
    )(xp, wp, bp)

    return out[:m, :n]


def net_after_pool(x_nchw, w1, b1, w2, b2):
    """x_nchw: (N, C, H, W) float32. Returns (N, H2) float32."""
    # After_Pool_Net is identity (features[14:] is empty).
    n = x_nchw.shape[0]
    x2d = x_nchw.reshape(n, -1)          # matches torch x.view(N, -1) on NCHW
    # Dropout layers (classifier[0], classifier[3]) are identity in eval mode.
    # TODO(synk): training-mode dropout (stochastic masking) not implemented.
    h = linear_relu(x2d, w1, b1)         # Linear + ReLU (classifier[1..2])
    out = linear_relu(h, w2, b2)         # Linear + ReLU (classifier[4..5])
    return out


if __name__ == "__main__":
    # Small, structure-preserving shapes (real AlexNet: D_in=9216, H=4096).
    N, C, H, W = 128, 16, 6, 6        # flattened D_in = 576 (padded to 640 in-kernel)
    D_IN = C * H * W
    H1, H2 = 256, 256                 # hidden widths of the two Linear layers

    key = jax.random.PRNGKey(0)
    kx, kw1, kb1, kw2, kb2 = jax.random.split(key, 5)

    x = jax.random.normal(kx, (N, C, H, W), dtype=jnp.float32)
    # Deterministic parameter init (synthetic weights, no checkpoint load).
    w1 = jax.random.normal(kw1, (D_IN, H1), dtype=jnp.float32) * 0.02
    b1 = jax.random.normal(kb1, (1, H1), dtype=jnp.float32) * 0.01
    w2 = jax.random.normal(kw2, (H1, H2), dtype=jnp.float32) * 0.02
    b2 = jax.random.normal(kb2, (1, H2), dtype=jnp.float32) * 0.01

    out = net_after_pool(x, w1, b1, w2, b2)
    out = jax.block_until_ready(out)

    # Pure-JAX f32 reference of the forward semantics (kernel uses bf16 MXU
    # operands with f32 accumulation, so tolerances are bf16-level).
    xf = x.reshape(N, -1)
    ref = jnp.maximum(jnp.maximum(xf @ w1 + b1, 0.0) @ w2 + b2, 0.0)
    assert out.shape == (N, H2)
    assert jnp.allclose(out, ref, atol=3e-2, rtol=3e-2), (
        float(jnp.max(jnp.abs(out - ref))))

    print("KERNEL_OK")
</pallas_src>

<mosaic_0001>
module attributes {stable_mosaic.version = 11 : i64} {
  func.func @linear_relu_kernel(%arg0: i32, %arg1: i32, %arg2: i32, %arg3: memref<128x128xbf16, #tpu.memory_space<vmem>>, %arg4: memref<128x128xbf16, #tpu.memory_space<vmem>>, %arg5: memref<1x128xf32, #tpu.memory_space<vmem>>, %arg6: memref<128x128xf32, #tpu.memory_space<vmem>>, %arg7: memref<128x128xf32, #tpu.memory_space<vmem>>) attributes {dimension_semantics = [#tpu.dimension_semantics<parallel>, #tpu.dimension_semantics<parallel>, #tpu.dimension_semantics<arbitrary>], iteration_bounds = array<i64: 1, 2, 5>, scalar_prefetch = 0 : i64, scratch_operands = 1 : i64, tpu.core_type = #tpu.core_type<tc>, window_params = [{transform_indices = @transform_0, window_bounds = array<i64: 128, 128>}, {transform_indices = @transform_1, window_bounds = array<i64: 128, 128>}, {transform_indices = @transform_2, window_bounds = array<i64: 1, 128>}, {transform_indices = @transform_3, window_bounds = array<i64: 128, 128>}]} {
    %c0_i32 = arith.constant 0 : i32
    %0 = arith.cmpi eq, %arg2, %c0_i32 : i32
    %1 = arith.extui %0 : i1 to i32
    %c0_i32_0 = arith.constant 0 : i32
    %2 = arith.cmpi ne, %1, %c0_i32_0 : i32
    scf.if %2 {
      %cst_9 = arith.constant 0.000000e+00 : f32
      %12 = vector.broadcast %cst_9 : f32 to vector<128x128xf32>
      %c0_10 = arith.constant 0 : index
      %c0_11 = arith.constant 0 : index
      %13 = vector.load %arg7[%c0_10, %c0_11] : memref<128x128xf32, #tpu.memory_space<vmem>>, vector<128x128xf32>
      tpu.vector_store %arg7[%c0_10, %c0_11], %12 {strides = array<i32>} : memref<128x128xf32, #tpu.memory_space<vmem>>, vector<128x128xf32>,
    } else {
    }
    %c0 = arith.constant 0 : index
    %c0_1 = arith.constant 0 : index
    %3 = vector.load %arg7[%c0, %c0_1] : memref<128x128xf32, #tpu.memory_space<vmem>>, vector<128x128xf32>
    %c0_2 = arith.constant 0 : index
    %c0_3 = arith.constant 0 : index
    %4 = vector.load %arg3[%c0_2, %c0_3] : memref<128x128xbf16, #tpu.memory_space<vmem>>, vector<128x128xbf16>
    %c0_4 = arith.constant 0 : index
    %c0_5 = arith.constant 0 : index
    %5 = vector.load %arg4[%c0_4, %c0_5] : memref<128x128xbf16, #tpu.memory_space<vmem>>, vector<128x128xbf16>
    %cst = arith.constant dense<0.000000e+00> : vector<128x128xf32>
    %6 = tpu.matmul %4, %5, %cst {dimension_numbers = #tpu.dot_dimension_numbers<[1], [0], [0], [1], [0, 0, 1, 1], [], []>} : vector<128x128xbf16>, vector<128x128xbf16>, vector<128x128xf32> -> vector<128x128xf32>
    %7 = arith.addf %3, %6 : vector<128x128xf32>
    %c0_6 = arith.constant 0 : index
    %c0_7 = arith.constant 0 : index
    %8 = vector.load %arg7[%c0_6, %c0_7] : memref<128x128xf32, #tpu.memory_space<vmem>>, vector<128x128xf32>
    tpu.vector_store %arg7[%c0_6, %c0_7], %7 {strides = array<i32>} : memref<128x128xf32, #tpu.memory_space<vmem>>, vector<128x128xf32>,
    %c4_i32 = arith.constant 4 : i32
    %9 = arith.cmpi eq, %arg2, %c4_i32 : i32
    %10 = arith.extui %9 : i1 to i32
    %c0_i32_8 = arith.constant 0 : i32
    %11 = arith.cmpi ne, %10, %c0_i32_8 : i32
    scf.if %11 {
      %c0_9 = arith.constant 0 : index
      %c0_10 = arith.constant 0 : index
      %12 = vector.load %arg7[%c0_9, %c0_10] : memref<128x128xf32, #tpu.memory_space<vmem>>, vector<128x128xf32>
      %c0_11 = arith.constant 0 : index
      %c0_12 = arith.constant 0 : index
      %13 = vector.load %arg5[%c0_11, %c0_12] : memref<1x128xf32, #tpu.memory_space<vmem>>, vector<1x128xf32>
      %14 = vector.broadcast %13 : vector<1x128xf32> to vector<128x128xf32>
      %15 = arith.addf %12, %14 : vector<128x128xf32>
      %cst_13 = arith.constant 0.000000e+00 : f32
      %16 = vector.broadcast %cst_13 : f32 to vector<128x128xf32>
      %17 = arith.maximumf %15, %16 : vector<128x128xf32>
      %c0_14 = arith.constant 0 : index
      %c0_15 = arith.constant 0 : index
      %18 = vector.load %arg6[%c0_14, %c0_15] : memref<128x128xf32, #tpu.memory_space<vmem>>, vector<128x128xf32>
      tpu.vector_store %arg6[%c0_14, %c0_15], %17 {strides = array<i32>} : memref<128x128xf32, #tpu.memory_space<vmem>>, vector<128x128xf32>,
    } else {
    }
    return
  }
  func.func @transform_0(%arg0: i32, %arg1: i32, %arg2: i32) -> (i32, i32) {
    %c0_i32 = arith.constant 0 : i32
    return %arg0, %arg2 : i32, i32
  }
  func.func @transform_1(%arg0: i32, %arg1: i32, %arg2: i32) -> (i32, i32) {
    %c0_i32 = arith.constant 0 : i32
    return %arg2, %arg1 : i32, i32
  }
  func.func @transform_2(%arg0: i32, %arg1: i32, %arg2: i32) -> (i32, i32) {
    %c0_i32 = arith.constant 0 : i32
    %c0_i32_0 = arith.constant 0 : i32
    return %c0_i32, %arg1 : i32, i32
  }
  func.func @transform_3(%arg0: i32, %arg1: i32, %arg2: i32) -> (i32, i32) {
    %c0_i32 = arith.constant 0 : i32
    return %arg0, %arg1 : i32, i32
  }
}

</mosaic_0001>

<bundles_post_ra>
// kernel: tpu_custom_call.1
= control target key start
LH: loop header
LB: loop body
LE: loop exit
PB: predicated region body
PF: predicated region fallthrough
CT: control target
= control target key end

     0   :  { %s1701_s0 = inlined_call_operand.hbm [shape: bf16[128,640], index: 0, kind: input, shape index: {}]   ;;  %s1702_s1 = inlined_call_operand.hbm [shape: bf16[640,256], index: 1, kind: input, shape index: {}]   ;;  %s1703_s2 = inlined_call_operand.vmem [shape: f32[1,256], index: 2, kind: input, shape index: {}]   ;;  %s1704_s3 = inlined_call_operand.hbm [shape: f32[128,256], index: 3, kind: output, shape index: {}]  }
   0x1   :  { %1717 = sst [smem:[#allocation17_spill]] %s1701_s0 }
   0x2   :  { %1718 = sst [smem:[#allocation18_spill]] %s1704_s3 }
   0x3   :  { %8 = vsyncpa [#allocation4], 0 }
   0x4   :  { %10 = vsyncpa [#allocation4 + $0x1], 0 }
   0x5   :  { %11 = vsyncpa [#allocation7], 0 }
   0x6   :  { %13 = vsyncpa [#allocation7 + $0x1], 0 }
   0x7   :  { %14 = vsyncpa [#allocation5], 0 }
   0x8   :  { %16 = vsyncpa [#allocation5 + $0x1], 0  ;;  %s1285_s12 = smov 0   ;;  %s1287_s13 = smov 0  }
   0x9   :  { %s1289_s14 = smov 0   ;;  %s1291_s15 = smov 0  }
   0xa   :  { %s1293_s16 = smov 0   ;;  %s1295_s17 = smov 0  }
   0xb   :  { %s1297_s18 = smov 0   ;;  %s1299_s19 = smov 0  }
   0xc   :  { %s1301_s20 = smov 0   ;;  %s1303_s21 = smov 0  }
   0xd   :  { %s1305_s22 = smov 0   ;;  %s1307_s23 = smov 0  }
   0xe   :  { %s1309_s24 = smov 0   ;;  %s1311_s25 = smov 0  }
   0xf LB: > { %1719 = sst [smem:[#allocation12_spill]] %s1232_s20  ;;  %s785_s26 = sadd.s32 4294967295, %s1252_s25   ;;  %s1252_s25 = sphi %s1311_s25, %s22_s25   ;;  %s1248_s24 = sphi %s1309_s24, %s1766_s24   ;;  %s1244_s23 = sphi %s1307_s23, %s1765_s23   ;;  %s1240_s22 = sphi %s1305_s22, %s1764_s22   ;;  %s1236_s21 = sphi %s1303_s21, %s1763_s21   ;;  %s1232_s20 = sphi %s1301_s20, %s1752_s20   ;;  %s1228_s19 = sphi %s1299_s19, %s1762_s19   ;;  %s1224_s18 = sphi %s1297_s18, %s1761_s18   ;;  %s1220_s17 = sphi %s1295_s17, %s1760_s17   ;;  %s1216_s16 = sphi %s1293_s16, %s1759_s16   ;;  %s1212_s15 = sphi %s1291_s15, %s1758_s15   ;;  %s1208_s14 = sphi %s1289_s14, %s1757_s14   ;;  %s1204_s13 = sphi %s1287_s13, %s1756_s13   ;;  %s1200_s12 = sphi %s1285_s12, %s1755_s12  }
  0x10   : > { %1720 = sst [smem:[#allocation13_spill]] %s1236_s21  ;;  %s34_s27 = sadd.s32 1, %s1244_s23 }
  0x11   : > { %p1355_p0 = scmp.ge.s32.totalorder %s34_s27, 5  ;;  %s50_s29 = sadd.s32 1, %s1232_s20 }
  0x12   : > { %p57_p1 = scmp.ne.s32.totalorder %s1232_s20, %s1228_s19  ;;  %p1708_p2 = scmp.eq.s32.totalorder %s1252_s25, 0 }
  0x13   : > { %s1768_s27 = smov (%p1355_p0, %s34_s27), 0  ;;  %p63_p4 = scmp.ne.s32.totalorder %s1228_s19, %s1224_s18 }
  0x14   : > { %1722 = sst [smem:[#allocation14_spill]] %s1768_s27  ;;  %p1369_p3 = por %p1708_p2, %p57_p1 }
  0x15   : > { %s1376_s4 = ssub.s32 %s1244_s23, %s1768_s27  ;;  %p1378_p5 = scmp.eq.s32.totalorder %s785_s26, 0 }
  0x16   : > { %p48_p6 = scmp.eq.s32.totalorder %s1376_s4, 0  ;;  %p1383_p7 = scmp.eq.s32.totalorder %s785_s26, 9 }
  0x17   : > { %s1724_s5 = scalar_select %p1378_p5, 1, 0 }
  0x18   : > { %s1725_s6 = scalar_select %p1383_p7, 1, 0 }
  0x19   : > { %p1389_p8 = por %p1378_p5, %p63_p4  ;;  %p1707_p9 = scmp.lt.s32.totalorder %s1252_s25, 10 }
  0x1a   : > { %s1394_s8 = scalar_select %p48_p6, %s1232_s20, %s50_s29  }
  0x1b   : > { %s1726_s7 = scalar_select %p1389_p8, 1, 0 }
  0x1c   : > { %1727 = sst [smem:[#allocation15_spill]] %s1394_s8  ;;  %s169_s9 = sand.u32 1, %s1232_s20  }
  0x1d   : > { %s789_s10 = sshll.u32 %s169_s9, 6  ;;  %s790_s11 = sshll.u32 %s1244_s23, 6 }
  0x1e   : > { %s1728_s0 = sld [smem:[#allocation17_spill]]  ;;  %s173_s26 = scalar_lea.vmem [#allocation3], %s789_s10 }
  0x1f   : > { %s182_s21 = sshll.u32 %s173_s26, 4  ;;  %p1410_p10 = pnand %p1707_p9, %p1369_p3  ;;  %s1404_s21 = int_to_ptr.vmem [resolvable:$true] %s182_s21 }
  0x20   : > { %s1414_s8 = scalar_lea.sflag [#allocation4], %s169_s9 }
  0x21   : > { %p1044_p12 = pneg %p1410_p10 }
  0x24   : > { %s1402_s3 = scalar_lea.hbm %s1728_s0, %s790_s11  ;;  %s1047_s30 = scalar_lea.hbm %s1728_s0, 5120 }
  0x25   : > { %s1042_s27 = scalar_lea.hbm %s1402_s3, 1024  ;;  %p1048_p3 = scmp.lt.u32.totalorder %s1402_s3, %s1728_s0 }
  0x26   : > { %p1043_p11 = scmp.ne.s32.totalorder %s1402_s3, %s1042_s27  ;;  %p1049_p4 = scmp.lt.u32.totalorder %s1047_s30, %s1042_s27 }
  0x27   : > { %p1051_p9 = scmp.lt.u32.totalorder %s1042_s27, %s1402_s3 }
  0x28   : > { %p1045_p13 = pnand %p1044_p12, %p1043_p11  ;;  %p1050_p6 = por %p1049_p4, %p1048_p3 }
  0x2a   : > { %p1046_p1 = pneg %p1045_p13  ;;  %p1052_p2 = por %p1051_p9, %p1050_p6 }
  0x2c   : > { %p1053_p8 = pnand %p1052_p2, %p1046_p1 }
  0x2e   : > { %1056 = shalt.err (!%p1053_p8)
}
  0x2f   : > { %s1057_s9 = scalar_lea.vmem %s1404_s21, 1024  ;;  %s1254_s10 = smov [#allocation3]  }
  0x30   : > { %p1058_p11 = scmp.ne.s32.totalorder %s1404_s21, %s1057_s9  ;;  %s1062_s11 = sshll.u32 %s1254_s10, 4  ;;  %s1063_s11 = int_to_ptr.vmem [resolvable:$false] %s1062_s11 }
  0x31   : > { %s1064_s18 = scalar_lea.vmem %s1063_s11, 2048  ;;  %p1065_p5 = scmp.lt.s32.totalorder %s1404_s21, %s1063_s11 }
  0x32   : > { %p1060_p13 = pnand %p1058_p11, %p1044_p12  ;;  %p1066_p3 = scmp.lt.s32.totalorder %s1064_s18, %s1057_s9 }
  0x34   : > { %p1061_p7 = pneg %p1060_p13  ;;  %p1067_p4 = por %p1066_p3, %p1065_p5 }
  0x36   : > { %p1068_p9 = pnand %p1067_p4, %p1061_p7 }
  0x38   : > { %1071 = shalt.err (!%p1068_p9)
}
  0x39   : > { %s1255_s27 = smov 320   ;;  %s1711_s30 = smov 64  }
  0x3a   : > { %s1712_s26 = smov 4   ;;  %p795_p2 = scmp.ge.s32.totalorder %s1252_s25, 1 }
  0x3b   : > { %896 = dma.hbm_to_vmem [thread:$0]  (!%p1410_p10), %s1402_s3, 1024, %s1404_s21, %s1414_s8, %s1255_s27, %s1711_s30, %s1712_s26  }
  0x3c   : > { %p219_p5 = scmp.lt.s32.totalorder %s1252_s25, 11  ;;  %s786_s10 = sadd.s32 4294967294, %s1252_s25  }
  0x3d   : > { %s37_s11 = sadd.s32 1, %s1248_s24  ;;  %s78_s18 = sadd.s32 1, %s1220_s17 }
  0x3e   : > { %p1446_p7 = pnand %p795_p2, %p219_p5  ;;  %s1770_s11 = smov (!%p1355_p0, %s37_s11), %s1248_s24 }
  0x3f   : > { %p85_p8 = scmp.ne.s32.totalorder %s1220_s17, %s1216_s16  ;;  %p91_p10 = scmp.ne.s32.totalorder %s1216_s16, %s1212_s15 }
  0x40   : > { %p39_p12 = scmp.ge.s32.totalorder %s1770_s11, 2  ;;  %s132_s3 = sadd.s32 1, %s1208_s14 }
  0x41   : > { %p1731_p1 = scmp.eq.s32.totalorder %s1252_s25, 0  ;;  %p1733_p11 = scmp.ne.s32.totalorder %s1724_s5, 0 }
  0x42   : > { %s1772_s11 = smov (%p39_p12, %s1770_s11), 0  ;;  %p142_p0 = scmp.ne.s32.totalorder %s1208_s14, %s1204_s13 }
  0x43   : > { %p1463_p6 = por %p85_p8, %p1731_p1  ;;  %p1469_p13 = por %p91_p10, %p1733_p11 }
  0x44   : > { %1735 = sst [smem:[#allocation16_spill]] %s1772_s11  ;;  %p148_p3 = scmp.ne.s32.totalorder %s1204_s13, %s1200_s12 }
  0x45   : > { %s1734_s8 = scalar_select %p1469_p13, 1, 0 }
  0x46   : > { %s74_s15 = ssub.s32 %s1248_s24, %s1772_s11  ;;  %p149_p4 = scmp.eq.s32.totalorder %s786_s10, 9 }
  0x47   : > { %s75_s28 = sor.u32 %s74_s15, %s1376_s4  ;;  %p130_p9 = scmp.eq.s32.totalorder %s74_s15, 0 }
  0x48   : > { %p76_p2 = scmp.eq.s32.totalorder %s75_s28, 0  ;;  %p1736_p5 = scmp.ne.s32.totalorder %s1725_s6, 0 }
  0x49   : > { %s1489_s29 = scalar_select %p130_p9, %s1208_s14, %s132_s3  }
  0x4a   : > { %p1484_p8 = por %p1736_p5, %p142_p0  ;;  %p1494_p10 = por %p149_p4, %p148_p3 }
  0x4b   : > { %s1492_s27 = scalar_select %p76_p2, %s1220_s17, %s78_s18  }
  0x4c   : > { %s1737_s5 = scalar_select %p1484_p8, 1, 0 }
  0x4d   : > { %s1738_s30 = scalar_select %p1494_p10, 1, 0 }
  0x4e   : > { %s192_s26 = sand.u32 1, %s1220_s17   ;;  %s822_s4 = sshll.u32 %s1244_s23, 5 }
  0x4f   : > { %s791_s10 = sshll.u32 %s192_s26, 6  ;;  %s202_s0 = sadd.s32 %s1248_s24, %s822_s4 }
  0x50   : > { %s196_s11 = scalar_lea.vmem [#allocation6], %s791_s10  ;;  %s794_s28 = sshll.u32 %s202_s0, 6 }
  0x51   : > { %s205_s15 = sshll.u32 %s196_s11, 4  ;;  %s1506_s3 = scalar_lea.hbm %s1702_s1, %s794_s28  ;;  %s1501_s15 = int_to_ptr.vmem [resolvable:$true] %s205_s15 }
  0x52   : > { %p1739_p12 = scmp.lt.s32.totalorder %s1252_s25, 10  ;;  %s1516_s0 = scalar_lea.sflag [#allocation7], %s192_s26 }
  0x53   : > { %s1072_s11 = scalar_lea.hbm %s1506_s3, 1024  ;;  %s1077_s10 = scalar_lea.hbm %s1702_s1, 10240 }
  0x54   : > { %p1512_p1 = pnand %p1739_p12, %p1463_p6  ;;  %p1073_p11 = scmp.ne.s32.totalorder %s1506_s3, %s1072_s11 }
  0x55   : > { %p1078_p6 = scmp.lt.u32.totalorder %s1506_s3, %s1702_s1  ;;  %p1079_p9 = scmp.lt.u32.totalorder %s1077_s10, %s1072_s11 }
  0x56   : > { %p1074_p0 = pneg %p1512_p1  ;;  %p1081_p5 = scmp.lt.u32.totalorder %s1072_s11, %s1506_s3 }
  0x57   : > { %p1080_p2 = por %p1079_p9, %p1078_p6 }
  0x58   : > { %p1075_p3 = pnand %p1074_p0, %p1073_p11 }
  0x59   : > { %p1082_p12 = por %p1081_p5, %p1080_p2 }
  0x5a   : > { %p1076_p4 = pneg %p1075_p3 }
  0x5c   : > { %p1083_p10 = pnand %p1082_p12, %p1076_p4 }
  0x5e   : > { %1086 = shalt.err (!%p1083_p10)
}
  0x5f   : > { %s1087_s26 = scalar_lea.vmem %s1501_s15, 1024  ;;  %s1258_s6 = smov [#allocation6]  }
  0x60   : > { %p1088_p11 = scmp.ne.s32.totalorder %s1501_s15, %s1087_s26  ;;  %s1092_s20 = sshll.u32 %s1258_s6, 4  ;;  %s1093_s20 = int_to_ptr.vmem [resolvable:$false] %s1092_s20 }
  0x61   : > { %s1094_s21 = scalar_lea.vmem %s1093_s20, 2048  ;;  %p1095_p13 = scmp.lt.s32.totalorder %s1501_s15, %s1093_s20 }
  0x62   : > { %p1090_p3 = pnand %p1088_p11, %p1074_p0  ;;  %p1096_p6 = scmp.lt.s32.totalorder %s1094_s21, %s1087_s26 }
  0x64   : > { %p1091_p8 = pneg %p1090_p3  ;;  %p1097_p9 = por %p1096_p6, %p1095_p13 }
  0x66   : > { %p1098_p2 = pnand %p1097_p9, %p1091_p8 }
  0x68   : > { %1101 = shalt.err (!%p1098_p2)
}
  0x69   : > { %s1259_s11 = smov 128   ;;  %s1741_s10 = smov 4  }
  0x6a   : > { %s1742_s4 = smov 64   ;;  %223 = sbr.rel (%p1446_p7) target bundleno = 435 (0x1b3), region = 32 }
  0x6b   : > { %899 = dma.hbm_to_vmem [thread:$0]  (!%p1512_p1), %s1506_s3, 1024, %s1501_s15, %s1516_s0, %s1259_s11, %s1742_s4, %s1741_s10  }
  0x6c   : > { %s225_s28 = sand.u32 (!%p1446_p7), 1, %s1228_s19   ;;  %p1743_p13 = scmp.ne.s32.totalorder (!%p1446_p7), %s1726_s7, 0 }
  0x6d   : > { %s796_s6 = sshll.u32 (!%p1446_p7), %s225_s28, 6  ;;  %s226_s26 = scalar_lea.sflag (!%p1446_p7), [#allocation4], %s225_s28 }
  0x6e   : > { %s1549_s20 = scalar_lea.vmem (!%p1446_p7), [#allocation3], %s796_s6 }
  0x71   : > { %1187 = dma.done.wait (%p1743_p13), %s226_s26, 1024  }
  0x72   : > { %1189 = vsyncadd (%p1743_p13), %s226_s26, 4294966272  ;;  %s234_s18 = sand.u32 1, %s1216_s16   ;;  %p1744_p7 = scmp.ne.s32.totalorder %s1734_s8, 0 }
  0x73   : > { %s797_s21 = sshll.u32 %s234_s18, 6  ;;  %s235_s15 = scalar_lea.sflag [#allocation7], %s234_s18 }
  0x74   : > { %s1556_s3 = scalar_lea.vmem [#allocation6], %s797_s21 }
  0x75   : > { %1191 = dma.done.wait (%p1744_p7), %s235_s15, 1024  }
  0x76   : > { %1193 = vsyncadd (%p1744_p7), %s235_s15, 4294966272  ;;  %s266_s9 = sand.u32 1, %s1204_s13   ;;  %p271_p8 = scmp.lt.s32.totalorder %s1240_s22, 1 }
  0x77   : > { %s798_s7 = sshll.u32 %s266_s9, 7  ;;  %s1745_s6 = sld [smem:[#allocation13_spill]] }
  0x78   : > { %s1567_s0 = scalar_select %p271_p8, %s1240_s22, 1 }
  0x79   : > { %s1573_s28 = scalar_lea.vmem [#allocation8], %s798_s7 }
  0x7a   : > { %s273_s4 = scalar_lea.vmem %s1703_s2, %s1567_s0 }
  0x7d   : > { %p799_p10 = scmp.ne.s32.totalorder %s1745_s6, 0 }
  0x7e   : > { %v1260_v0 = vmov (!%p799_p10), 0.0  }
  0x7f   : > { %279 = sbr.rel (%p799_p10) target bundleno = 135 (0x87), region = 44  ;;  %280 = vst [vmem:[#allocation2] sm:$0xff] (!%p799_p10), %v1260_v0  ;;  %281 = vst [vmem:[#allocation2 + $0x8] sm:$0xff] (!%p799_p10), %v1260_v0 }
  0x80   : > { %282 = vst [vmem:[#allocation2 + $0x10] sm:$0xff] (!%p799_p10), %v1260_v0  ;;  %283 = vst [vmem:[#allocation2 + $0x18] sm:$0xff] (!%p799_p10), %v1260_v0 }
  0x81   : > { %284 = vst [vmem:[#allocation2 + $0x20] sm:$0xff] (!%p799_p10), %v1260_v0  ;;  %285 = vst [vmem:[#allocation2 + $0x28] sm:$0xff] (!%p799_p10), %v1260_v0 }
  0x82   : > { %286 = vst [vmem:[#allocation2 + $0x30] sm:$0xff] (!%p799_p10), %v1260_v0  ;;  %287 = vst [vmem:[#allocation2 + $0x38] sm:$0xff] (!%p799_p10), %v1260_v0 }
  0x83   : > { %288 = vst [vmem:[#allocation2 + $0x40] sm:$0xff] (!%p799_p10), %v1260_v0  ;;  %289 = vst [vmem:[#allocation2 + $0x48] sm:$0xff] (!%p799_p10), %v1260_v0 }
  0x84   : > { %290 = vst [vmem:[#allocation2 + $0x50] sm:$0xff] (!%p799_p10), %v1260_v0  ;;  %291 = vst [vmem:[#allocation2 + $0x58] sm:$0xff] (!%p799_p10), %v1260_v0 }
  0x85   : > { %292 = vst [vmem:[#allocation2 + $0x60] sm:$0xff] (!%p799_p10), %v1260_v0  ;;  %293 = vst [vmem:[#allocation2 + $0x68] sm:$0xff] (!%p799_p10), %v1260_v0 }
  0x86   : > { %294 = vst [vmem:[#allocation2 + $0x70] sm:$0xff] %v1260_v0  ;;  %295 = vst [vmem:[#allocation2 + $0x78] sm:$0xff] %v1260_v0 }
  0x87 PF: > { %v1026_v1 = vld [vmem:[%s1556_s3] sm:$0xff]   ;;  %v1027_v2 = vld [vmem:[%s1556_s3 + $0x8] sm:$0xff]   ;;  %v1028_v3 = vld [vmem:[%s1556_s3 + $0x10] sm:$0xff]   ;;  %s1746_s8 = sld [smem:[#allocation13_spill]] }
  0x88   : > { %839 = vmatprep.subr.bf16.mxu0 %v1026_v1  ;;  %871 = vmatprep.subr.bf16.mxu1 %v1026_v1  ;;  %v1029_v4 = vld [vmem:[%s1556_s3 + $0x18] sm:$0xff]   ;;  %v1034_v5 = vld [vmem:[%s1549_s20] sm:$0xff]   ;;  %v1031_v8 = vld [vmem:[%s1556_s3 + $0x28] sm:$0xff]  }
  0x89   : > { %840 = vmatpush3.bf16.msra.mxu0 %v1026_v1  ;;  %879 = vmatpush3.bf16.msra.mxu1 %v1026_v1  ;;  %v1035_v6 = vld [vmem:[%s1549_s20 + $0x20] sm:$0xff]   ;;  %v1032_v9 = vld [vmem:[%s1556_s3 + $0x30] sm:$0xff]   ;;  %v1033_v10 = vld [vmem:[%s1556_s3 + $0x38] sm:$0xff]  }
  0x8a   : > { %841 = vmatprep.subr.bf16.mxu0 %v1027_v2  ;;  %872 = vmatprep.subr.bf16.mxu1 %v1027_v2  ;;  %v1030_v7 = vld [vmem:[%s1556_s3 + $0x20] sm:$0xff]   ;;  %v1036_v11 = vld [vmem:[%s1549_s20 + $0x8] sm:$0xff]   ;;  %v1038_v13 = vld [vmem:[%s1549_s20 + $0x10] sm:$0xff]  }
  0x8b   : > { %855 = vmatprep.mubr.bf16.mxu0 %v1034_v5  ;;  %863 = vmatprep.mubr.bf16.mxu1 %v1035_v6  ;;  %v1037_v12 = vld [vmem:[%s1549_s20 + $0x28] sm:$0xff]   ;;  %v1039_v14 = vld [vmem:[%s1549_s20 + $0x30] sm:$0xff]   ;;  %v1040_v15 = vld [vmem:[%s1549_s20 + $0x18] sm:$0xff]  }
  0x8c   : > { %v1041_v16 = vld [vmem:[%s1549_s20 + $0x38] sm:$0xff]   ;;  %v298_v17 = vld [vmem:[#allocation2 + $0x10] sm:$0xff]  ;;  %v296_v19 = vld [vmem:[#allocation2] sm:$0xff] }
  0x8d   : > { %842 = vmatpush3.bf16.msra.mxu0 %v1027_v2  ;;  %880 = vmatpush3.bf16.msra.mxu1 %v1027_v2  ;;  %v306_v18 = vld [vmem:[#allocation2 + $0x50] sm:$0xff]  ;;  %v304_v20 = vld [vmem:[#allocation2 + $0x40] sm:$0xff]  ;;  %v299_v23 = vld [vmem:[#allocation2 + $0x18] sm:$0xff]  ;;  %p816_p1 = scmp.ne.s32.totalorder %s1746_s8, 4 }
  0x8e   : > { %843 = vmatprep.subr.bf16.mxu0 %v1028_v3  ;;  %873 = vmatprep.subr.bf16.mxu1 %v1028_v3  ;;  %v307_v24 = vld [vmem:[#allocation2 + $0x58] sm:$0xff]  ;;  %v297_v29 = vld [vmem:[#allocation2 + $0x8] sm:$0xff]  ;;  %v302_v41 = vld [vmem:[#allocation2 + $0x30] sm:$0xff] }
  0x8f   : > { %v305_v30 = vld [vmem:[#allocation2 + $0x48] sm:$0xff]  ;;  %v310_v42 = vld [vmem:[#allocation2 + $0x70] sm:$0xff]  ;;  %v300_v43 = vld [vmem:[#allocation2 + $0x20] sm:$0xff] }
  0x90   : > { %v308_v44 = vld [vmem:[#allocation2 + $0x60] sm:$0xff]  ;;  %v303_v47 = vld [vmem:[#allocation2 + $0x38] sm:$0xff]  ;;  %v301_v53 = vld [vmem:[#allocation2 + $0x28] sm:$0xff] }
  0x91   : > { %844 = vmatpush3.bf16.msra.mxu0 %v1028_v3  ;;  %881 = vmatpush3.bf16.msra.mxu1 %v1028_v3  ;;  %v311_v48 = vld [vmem:[#allocation2 + $0x78] sm:$0xff]  ;;  %v309_v54 = vld [vmem:[#allocation2 + $0x68] sm:$0xff]  ;;  %v817_v2 = vld [vmem:[%s273_s4] ss:$0 sm:$0xff] (!%p816_p1) }
  0x92   : > { %845 = vmatprep.subr.bf16.mxu0 %v1029_v4  ;;  %874 = vmatprep.subr.bf16.mxu1 %v1029_v4 }
  0x95   : > { %846 = vmatpush3.bf16.msra.mxu0 %v1029_v4  ;;  %882 = vmatpush3.bf16.msra.mxu1 %v1029_v4 }
  0x96   : > { %847 = vmatprep.subr.bf16.mxu0 %v1030_v7  ;;  %875 = vmatprep.subr.bf16.mxu1 %v1030_v7 }
  0x99   : > { %848 = vmatpush3.bf16.msra.mxu0 %v1030_v7  ;;  %883 = vmatpush3.bf16.msra.mxu1 %v1030_v7 }
  0x9a   : > { %849 = vmatprep.subr.bf16.mxu0 %v1031_v8  ;;  %876 = vmatprep.subr.bf16.mxu1 %v1031_v8 }
  0x9d   : > { %850 = vmatpush3.bf16.msra.mxu0 %v1031_v8  ;;  %884 = vmatpush3.bf16.msra.mxu1 %v1031_v8 }
  0x9e   : > { %851 = vmatprep.subr.bf16.mxu0 %v1032_v9  ;;  %877 = vmatprep.subr.bf16.mxu1 %v1032_v9 }
  0xa1   : > { %852 = vmatpush3.bf16.msra.mxu0 %v1032_v9  ;;  %885 = vmatpush3.bf16.msra.mxu1 %v1032_v9 }
  0xa2   : > { %853 = vmatprep.subr.bf16.mxu0 %v1033_v10  ;;  %878 = vmatprep.subr.bf16.mxu1 %v1033_v10 }
  0xa5   : > { %854 = vmatpush3.bf16.msra.mxu0 %v1033_v10  ;;  %886 = vmatpush3.bf16.msra.mxu1 %v1033_v10 }
  0xa8   : > { %856 = vmatmul.mubr.bf16.vlgmr.msra.gmra.mrb[0].mxu0 %v1036_v11  ;;  %864 = vmatmul.mubr.bf16.vlgmr.msra.gmra.mrb[0].mxu1 %v1037_v12 }
  0xa9   : > { %859 = vmatprep.mubr.bf16.mxu0 %v1038_v13  ;;  %867 = vmatprep.mubr.bf16.mxu1 %v1039_v14 }
  0xb0   : > { %860 = vmatmul.mubr.bf16.gmra.mrb[4].mxu0 %v1040_v15  ;;  %868 = vmatmul.mubr.bf16.gmra.mrb[4].mxu1 %v1041_v16 }
 0x17b   : > { %v857_v21 = vpop.f32.mrb[0].mxu0  ;;  %v865_v22 = vpop.f32.mrb[0].mxu1 }
 0x17c   : > { %v539_v25 = vadd.f32 %v857_v21, %v298_v17  ;;  %v547_v26 = vadd.f32 %v865_v22, %v306_v18  ;;  %v474_v27 = vpop.f32.mrb[1].mxu0  ;;  %v506_v28 = vpop.f32.mrb[1].mxu1 }
 0x17d   : > { %v537_v31 = vadd.f32 %v474_v27, %v296_v19  ;;  %v545_v32 = vadd.f32 %v506_v28, %v304_v20  ;;  %v858_v33 = vpop.f32.mrb[2].mxu0  ;;  %v866_v34 = vpop.f32.mrb[2].mxu1 }
 0x17e   : > { %555 = vst [vmem:[#allocation2 + $0x10] sm:$0xff] %v539_v25  ;;  %563 = vst [vmem:[#allocation2 + $0x50] sm:$0xff] %v547_v26  ;;  %v540_v35 = vadd.f32 %v858_v33, %v299_v23  ;;  %v548_v36 = vadd.f32 %v866_v34, %v307_v24  ;;  %v477_v37 = vpop.f32.mrb[3].mxu0  ;;  %v509_v38 = vpop.f32.mrb[3].mxu1 }
 0x17f   : > { %553 = vst [vmem:[#allocation2] sm:$0xff] %v537_v31  ;;  %561 = vst [vmem:[#allocation2 + $0x40] sm:$0xff] %v545_v32  ;;  %v538_v39 = vadd.f32 %v477_v37, %v297_v29  ;;  %v546_v40 = vadd.f32 %v509_v38, %v305_v30 }
 0x180   : > { %556 = vst [vmem:[#allocation2 + $0x18] sm:$0xff] %v540_v35  ;;  %564 = vst [vmem:[#allocation2 + $0x58] sm:$0xff] %v548_v36 }
 0x181   : > { %554 = vst [vmem:[#allocation2 + $0x8] sm:$0xff] %v538_v39  ;;  %562 = vst [vmem:[#allocation2 + $0x48] sm:$0xff] %v546_v40 }
 0x183   : > { %v861_v45 = vpop.f32.mrb[4].mxu0  ;;  %v869_v46 = vpop.f32.mrb[4].mxu1  ;;  %572 = sbr.rel (%p816_p1) target bundleno = 407 (0x197), region = 48 }
 0x184   : > { %v543_v49 = vadd.f32 %v861_v45, %v302_v41  ;;  %v551_v50 = vadd.f32 %v869_v46, %v310_v42  ;;  %v490_v51 = vpop.f32.mrb[5].mxu0  ;;  %v522_v52 = vpop.f32.mrb[5].mxu1 }
 0x185   : > { %v541_v55 = vadd.f32 %v490_v51, %v300_v43  ;;  %v549_v56 = vadd.f32 %v522_v52, %v308_v44  ;;  %v862_v57 = vpop.f32.mrb[6].mxu0  ;;  %v870_v58 = vpop.f32.mrb[6].mxu1  ;;  %v575_v6 = vld [vmem:[#allocation2 + $0x10] sm:$0xff] (!%p816_p1) }
 0x186   : > { %559 = vst [vmem:[#allocation2 + $0x30] sm:$0xff] %v543_v49  ;;  %567 = vst [vmem:[#allocation2 + $0x70] sm:$0xff] %v551_v50  ;;  %v544_v59 = vadd.f32 %v862_v57, %v303_v47  ;;  %v552_v60 = vadd.f32 %v870_v58, %v311_v48  ;;  %v493_v61 = vpop.f32.mrb[7].mxu0  ;;  %v525_v62 = vpop.f32.mrb[7].mxu1  ;;  %v573_v1 = vld [vmem:[#allocation2] sm:$0xff] (!%p816_p1)  ;;  %v598_v9 = vadd.f32 (!%p816_p1), %v817_v2, %v575_v6  ;;  %v583_v21 = vld [vmem:[#allocation2 + $0x50] sm:$0xff] (!%p816_p1) }
 0x187   : > { %557 = vst [vmem:[#allocation2 + $0x20] sm:$0xff] %v541_v55  ;;  %565 = vst [vmem:[#allocation2 + $0x60] sm:$0xff] %v549_v56  ;;  %v542_v63 = vadd.f32 %v493_v61, %v301_v53  ;;  %v550_v0 = vadd.f32 %v525_v62, %v309_v54  ;;  %v596_v4 = vadd.f32 (!%p816_p1), %v817_v2, %v573_v1  ;;  %v576_v7 = vld [vmem:[#allocation2 + $0x18] sm:$0xff] (!%p816_p1)  ;;  %v581_v19 = vld [vmem:[#allocation2 + $0x40] sm:$0xff] (!%p816_p1) }
 0x188   : > { %560 = vst [vmem:[#allocation2 + $0x38] sm:$0xff] %v544_v59  ;;  %568 = vst [vmem:[#allocation2 + $0x78] sm:$0xff] %v552_v60  ;;  %v574_v3 = vld [vmem:[#allocation2 + $0x8] sm:$0xff] (!%p816_p1)  ;;  %v599_v10 = vadd.f32 (!%p816_p1), %v817_v2, %v576_v7  ;;  %v614_v22 = vmax.f32 (!%p816_p1), %v598_v9, 0.0  ;;  %v584_v26 = vld [vmem:[#allocation2 + $0x58] sm:$0xff] (!%p816_p1)  ;;  %v604_v31 = vadd.f32 (!%p816_p1), %v817_v2, %v581_v19  ;;  %v606_v36 = vadd.f32 (!%p816_p1), %v817_v2, %v583_v21 }
 0x189   : > { %558 = vst [vmem:[#allocation2 + $0x28] sm:$0xff] %v542_v63  ;;  %566 = vst [vmem:[#allocation2 + $0x68] sm:$0xff] %v550_v0  ;;  %v597_v5 = vadd.f32 (!%p816_p1), %v817_v2, %v574_v3  ;;  %v612_v15 = vmax.f32 (!%p816_p1), %v596_v4, 0.0  ;;  %v582_v20 = vld [vmem:[#allocation2 + $0x48] sm:$0xff] (!%p816_p1)  ;;  %v607_v37 = vadd.f32 (!%p816_p1), %v817_v2, %v584_v26 }
 0x18a   : > { %v615_v23 = vmax.f32 %v599_v10, 0.0  ;;  %v605_v32 = vadd.f32 %v817_v2, %v582_v20  ;;  %630 = vst [vmem:[%s1573_s28 + $0x10] sm:$0xff] %v614_v22  ;;  %v620_v39 = vmax.f32 %v604_v31, 0.0  ;;  %v622_v43 = vmax.f32 %v606_v36, 0.0 }
 0x18b   : > { %v613_v16 = vmax.f32 %v597_v5, 0.0  ;;  %628 = vst [vmem:[%s1573_s28] sm:$0xff] %v612_v15  ;;  %v623_v44 = vmax.f32 %v607_v37, 0.0 }
 0x18c   : > { %631 = vst [vmem:[%s1573_s28 + $0x18] sm:$0xff] %v615_v23  ;;  %v621_v40 = vmax.f32 %v605_v32, 0.0  ;;  %636 = vst [vmem:[%s1573_s28 + $0x40] sm:$0xff] %v620_v39 }
 0x18d   : > { %v579_v13 = vld [vmem:[#allocation2 + $0x30] sm:$0xff]  ;;  %629 = vst [vmem:[%s1573_s28 + $0x8] sm:$0xff] %v613_v16  ;;  %638 = vst [vmem:[%s1573_s28 + $0x50] sm:$0xff] %v622_v43 }
 0x18e   : > { %v577_v8 = vld [vmem:[#allocation2 + $0x20] sm:$0xff]  ;;  %v602_v18 = vadd.f32 %v817_v2, %v579_v13  ;;  %v587_v33 = vld [vmem:[#allocation2 + $0x70] sm:$0xff]  ;;  %637 = vst [vmem:[%s1573_s28 + $0x48] sm:$0xff] %v621_v40  ;;  %639 = vst [vmem:[%s1573_s28 + $0x58] sm:$0xff] %v623_v44 }
 0x18f   : > { %v600_v11 = vadd.f32 %v817_v2, %v577_v8  ;;  %v580_v14 = vld [vmem:[#allocation2 + $0x38] sm:$0xff]  ;;  %v585_v27 = vld [vmem:[#allocation2 + $0x60] sm:$0xff]  ;;  %v610_v42 = vadd.f32 %v817_v2, %v587_v33 }
 0x190   : > { %v578_v12 = vld [vmem:[#allocation2 + $0x28] sm:$0xff]  ;;  %v603_v25 = vadd.f32 %v817_v2, %v580_v14  ;;  %v618_v30 = vmax.f32 %v602_v18, 0.0  ;;  %v588_v34 = vld [vmem:[#allocation2 + $0x78] sm:$0xff]  ;;  %v608_v38 = vadd.f32 %v817_v2, %v585_v27 }
 0x191   : > { %v601_v17 = vadd.f32 %v817_v2, %v578_v12  ;;  %v616_v24 = vmax.f32 %v600_v11, 0.0  ;;  %v586_v28 = vld [vmem:[#allocation2 + $0x68] sm:$0xff]  ;;  %v611_v46 = vadd.f32 %v817_v2, %v588_v34  ;;  %v626_v48 = vmax.f32 %v610_v42, 0.0 }
 0x192   : > { %v619_v35 = vmax.f32 %v603_v25, 0.0  ;;  %634 = vst [vmem:[%s1573_s28 + $0x30] sm:$0xff] %v618_v30  ;;  %v609_v41 = vadd.f32 %v817_v2, %v586_v28  ;;  %v624_v45 = vmax.f32 %v608_v38, 0.0 }
 0x193   : > { %v617_v29 = vmax.f32 %v601_v17, 0.0  ;;  %632 = vst [vmem:[%s1573_s28 + $0x20] sm:$0xff] %v616_v24  ;;  %v627_v49 = vmax.f32 %v611_v46, 0.0  ;;  %642 = vst [vmem:[%s1573_s28 + $0x70] sm:$0xff] %v626_v48 }
 0x194   : > { %635 = vst [vmem:[%s1573_s28 + $0x38] sm:$0xff] %v619_v35  ;;  %v625_v47 = vmax.f32 %v609_v41, 0.0  ;;  %640 = vst [vmem:[%s1573_s28 + $0x60] sm:$0xff] %v624_v45 }
 0x195   : > { %633 = vst [vmem:[%s1573_s28 + $0x28] sm:$0xff] %v617_v29  ;;  %643 = vst [vmem:[%s1573_s28 + $0x78] sm:$0xff] %v627_v49 }
 0x196   : > { %641 = vst [vmem:[%s1573_s28 + $0x68] sm:$0xff] %v625_v47 }
 0x197 PF: > { %s819_s18 = sshll.u32 %s1240_s22, 7  ;;  %s1747_s3 = sld [smem:[#allocation18_spill]] }
 0x198   : > { %s660_s0 = sshll.u32 %s1573_s28, 4  ;;  %s1625_s11 = scalar_lea.sflag [#allocation5], %s266_s9  ;;  %s1621_s0 = int_to_ptr.vmem [resolvable:$true] %s660_s0 }
 0x199   : > { %s1102_s10 = scalar_lea.vmem %s1621_s0, 2048  ;;  %p1748_p4 = scmp.ne.s32.totalorder %s1737_s5, 0 }
 0x19a   : > { %p1103_p0 = scmp.ne.s32.totalorder %s1621_s0, %s1102_s10  ;;  %s1261_s22 = smov [#allocation8]  }
 0x19b   : > { %s1106_s4 = sshll.u32 %s1261_s22, 4  ;;  %s1107_s4 = int_to_ptr.vmem [resolvable:$false] %s1106_s4 }
 0x19c   : > { %p1104_p5 = pnand %p1103_p0, %p1748_p4  ;;  %s1108_s6 = scalar_lea.vmem %s1107_s4, 4096 }
 0x19d   : > { %s1618_s7 = scalar_lea.hbm %s1747_s3, %s819_s18  ;;  %p1109_p11 = scmp.lt.s32.totalorder %s1621_s0, %s1107_s4 }
 0x19e   : > { %p1105_p12 = pneg %p1104_p5  ;;  %p1110_p3 = scmp.lt.s32.totalorder %s1108_s6, %s1102_s10 }
 0x1a0   : > { %p1111_p6 = por %p1110_p3, %p1109_p11 }
 0x1a2   : > { %p1112_p9 = pnand %p1111_p6, %p1105_p12 }
 0x1a4   : > { %1115 = shalt.err (!%p1112_p9)
}
 0x1a5   : > { %s1116_s9 = scalar_lea.hbm %s1618_s7, 2048  ;;  %s1120_s26 = scalar_lea.hbm %s1747_s3, 4096 }
 0x1a6   : > { %p1117_p2 = scmp.ne.s32.totalorder %s1618_s7, %s1116_s9  ;;  %p1121_p8 = scmp.lt.u32.totalorder %s1618_s7, %s1747_s3 }
 0x1a7   : > { %p1122_p10 = scmp.lt.u32.totalorder %s1120_s26, %s1116_s9  ;;  %p1124_p0 = scmp.lt.u32.totalorder %s1116_s9, %s1618_s7 }
 0x1a8   : > { %p1118_p13 = pnand %p1117_p2, %p1748_p4 }
 0x1a9   : > { %p1123_p1 = por %p1122_p10, %p1121_p8 }
 0x1aa   : > { %p1119_p7 = pneg %p1118_p13 }
 0x1ab   : > { %p1125_p5 = por %p1124_p0, %p1123_p1 }
 0x1ad   : > { %p1126_p12 = pnand %p1125_p5, %p1119_p7 }
 0x1af   : > { %1129 = shalt.err (!%p1126_p12)
}
 0x1b0   : > { %s1262_s21 = smov 128   ;;  %s1263_s15 = smov 256  }
 0x1b1   : > { %s1264_s10 = smov 8  }
 0x1b2   : > { %891 = dma.vmem_to_hbm [thread:$0]  (%p1748_p4), %s1621_s0, 2048, %s1618_s7, %s1625_s11, %s1262_s21, %s1263_s15, %s1264_s10  }
 0x1b3 PF: > { %p905_p11 = scmp.ge.s32.totalorder %s1252_s25, 2  ;;  %s675_s22 = sand.u32 1, %s1200_s12  }
 0x1b4   : > { %p1749_p3 = scmp.ne.s32.totalorder %s1738_s30, 0  ;;  %s676_s4 = scalar_lea.sflag [#allocation5], %s675_s22 }
 0x1b6   : > { %p901_p6 = pnand %p905_p11, %p1749_p3 }
 0x1b8   : > { %1195 = dma.done.wait (!%p901_p6), %s676_s4, 2048  }
 0x1b9   : > { %1197 = vsyncadd (!%p901_p6), %s676_s4, 4294965248  ;;  %s22_s25 = sadd.s32 1, %s1252_s25   ;;  %s1751_s5 = sld [smem:[#allocation12_spill]] }
 0x1ba   : > { %p1654_p9 = scmp.ge.s32.totalorder %s22_s25, 12   ;;  %s1752_s20 = sld [smem:[#allocation15_spill]] }
 0x1bb   : > { %s1753_s30 = sld [smem:[#allocation14_spill]]  ;;  %s1754_s7 = sld [smem:[#allocation16_spill]] }
 0x1bc   : > { %s1755_s12 = smov %s1204_s13  ;;  %s1756_s13 = smov %s1208_s14 }
 0x1bd   : > { %s1757_s14 = smov %s1489_s29  ;;  %s1758_s15 = smov %s1216_s16 }
 0x1be   : > { %s1759_s16 = smov %s1220_s17  ;;  %s1760_s17 = smov %s1492_s27 }
 0x1bf   : > { %s1761_s18 = smov %s1228_s19  ;;  %s1762_s19 = smov %s1751_s5 }
 0x1c0   : > { %s1763_s21 = smov %s1244_s23  ;;  %s1764_s22 = smov %s1248_s24 }
 0x1c1   : > { %s1765_s23 = smov %s1753_s30  ;;  %s1766_s24 = smov %s1754_s7 }
 0x1c2   :  { %21 = sbr.rel (!%p1654_p9) target bundleno = 15 (0xf), region = 101 }
 0x1c9   :  { %681 = vsyncpa [#allocation4], 1 }
 0x1ca   :  { %683 = vsyncpa [#allocation4 + $0x1], 1 }
 0x1cb   :  { %684 = vsyncpa [#allocation7], 1 }
 0x1cc   :  { %686 = vsyncpa [#allocation7 + $0x1], 1 }
 0x1cd   :  { %687 = vsyncpa [#allocation5], 1 }
 0x1ce   :  { %689 = vsyncpa [#allocation5 + $0x1], 1 }

</bundles_post_ra>
